<compile_context>
chip_gen: v7x
topology: tpu7x:2x2x1
jax: 0.10.0
libtpu: 0.0.40
codegen_flags: <defaults>
</compile_context>

<pallas_src>
import jax
import jax.numpy as jnp
from jax.experimental import pallas as pl
from jax.experimental.pallas import tpu as pltpu


def _round_up(x, m):
    return (x + m - 1) // m * m


def critic_kernel(s_ref, a_ref, w1s_ref, w1a_ref, b1_ref,
                  w2_ref, b2_ref, w3_ref, b3_ref, q_ref):
    # fc1 on the concatenated input, done as two MXU matmuls (no concat needed):
    #   x @ W1 == state @ W1_state + action @ W1_action
    s_bf = s_ref[...].astype(jnp.bfloat16)
    a_bf = a_ref[...].astype(jnp.bfloat16)
    h1 = jnp.dot(s_bf, w1s_ref[...], preferred_element_type=jnp.float32)
    h1 = h1 + jnp.dot(a_bf, w1a_ref[...], preferred_element_type=jnp.float32)
    h1 = jnp.maximum(h1 + b1_ref[...], 0.0)                     # f32 bias + ReLU

    # fc2 + ReLU
    h2 = jnp.dot(h1.astype(jnp.bfloat16), w2_ref[...],
                 preferred_element_type=jnp.float32)
    h2 = jnp.maximum(h2 + b2_ref[...], 0.0)                     # f32 bias + ReLU

    # q1 head (out_features = 1): VPU multiply + cross-lane reduce; MXU stays free
    # and we avoid a 1/128-occupied matmul result group.
    q = jnp.sum(h2 * w3_ref[...], axis=-1, keepdims=True) + b3_ref[...]   # (tb, 1)

    # Lane-dense store: broadcast q across the 128-lane output slab.
    q_ref[...] = jnp.broadcast_to(q, q_ref.shape).astype(q_ref.dtype)


def critic_forward(state, action, params, tile_b=256):
    """Fused TD3 critic forward. state: (B, S), action: (B, A) -> q: (B, 1)."""
    w1, b1, w2, b2, w3, b3 = params          # w1: (S+A, fc1), ..., w3: (fc2, 1)
    B, S = state.shape
    A = action.shape[1]
    FC1 = w1.shape[1]
    FC2 = w2.shape[1]
    FC1_PAD = _round_up(FC1, 128)            # 400 -> 512
    FC2_PAD = _round_up(FC2, 128)            # 300 -> 384

    # --- parameter prep (pure layout / cast, done once per call in the wrapper) ---
    # Split W1 so the kernel never needs cat([state, action], dim=1).
    w1s = w1[:S]
    w1a = w1[S:]
    # Zero-pad hidden dims to lane multiples; zeros pass through ReLU and the
    # zero-padded rows of the next layer annihilate them (semantics preserved).
    w1s_p = jnp.pad(w1s, ((0, 0), (0, FC1_PAD - FC1))).astype(jnp.bfloat16)
    w1a_p = jnp.pad(w1a, ((0, 0), (0, FC1_PAD - FC1))).astype(jnp.bfloat16)
    b1_p = jnp.pad(b1, ((0, 0), (0, FC1_PAD - FC1)))                      # f32
    w2_p = jnp.pad(w2, ((0, FC1_PAD - FC1), (0, FC2_PAD - FC2))).astype(jnp.bfloat16)
    b2_p = jnp.pad(b2, ((0, 0), (0, FC2_PAD - FC2)))                      # f32
    w3_row = jnp.pad(w3.T, ((0, 0), (0, FC2_PAD - FC2)))                  # (1, FC2_PAD), f32
    b3_2d = b3.reshape(1, 1)                                              # (1, 1), f32

    # --- batch tiling: full-height MXU tiles, pipelined x/q DMA, weights resident ---
    if B <= tile_b:
        tb = max(8, _round_up(B, 8))         # single grid step at small B
    else:
        tb = tile_b
    B_pad = _round_up(B, tb)
    s_p = jnp.pad(state, ((0, B_pad - B), (0, 0)))
    a_p = jnp.pad(action, ((0, B_pad - B), (0, 0)))

    grid = (B_pad // tb,)
    resident = lambda shape: pl.BlockSpec(shape, lambda i: (0, 0))

    out = pl.pallas_call(
        critic_kernel,
        out_shape=jax.ShapeDtypeStruct((B_pad, 128), jnp.float32),
        grid=grid,
        in_specs=[
            pl.BlockSpec((tb, S), lambda i: (i, 0)),     # state tile (pipelined)
            pl.BlockSpec((tb, A), lambda i: (i, 0)),     # action tile (pipelined)
            resident((S, FC1_PAD)),                      # W1_state   (VMEM-resident)
            resident((A, FC1_PAD)),                      # W1_action
            resident((1, FC1_PAD)),                      # b1
            resident((FC1_PAD, FC2_PAD)),                # W2
            resident((1, FC2_PAD)),                      # b2
            resident((1, FC2_PAD)),                      # w3 row
            resident((1, 1)),                            # b3
        ],
        out_specs=pl.BlockSpec((tb, 128), lambda i: (i, 0)),
        compiler_params=pltpu.CompilerParams(
            dimension_semantics=("parallel",)),          # 2-TC sharding on v7x
    )(s_p, a_p, w1s_p, w1a_p, b1_p, w2_p, b2_p, w3_row, b3_2d)

    return out[:B, :1]


def init_params(key, in_features, n_actions, fc1_dims=400, fc2_dims=300):
    """Deterministic PyTorch-style init: U(-1/sqrt(fan_in), 1/sqrt(fan_in))."""
    d_in = in_features + n_actions
    dims = [(d_in, fc1_dims), (fc1_dims, fc2_dims), (fc2_dims, 1)]
    params = []
    for (fan_in, fan_out) in dims:
        key, kw, kb = jax.random.split(key, 3)
        bound = 1.0 / (fan_in ** 0.5)
        w = jax.random.uniform(kw, (fan_in, fan_out), jnp.float32, -bound, bound)
        b = jax.random.uniform(kb, (1, fan_out), jnp.float32, -bound, bound)
        params += [w, b]
    return tuple(params)


if __name__ == "__main__":
    key = jax.random.PRNGKey(0)
    B, INPUT_DIMS, N_ACTIONS = 2, 8, 2

    k_params, k_state, k_action = jax.random.split(key, 3)
    params = init_params(k_params, INPUT_DIMS, N_ACTIONS)
    state = jax.random.normal(k_state, (B, INPUT_DIMS), jnp.float32)
    action = jax.random.normal(k_action, (B, N_ACTIONS), jnp.float32)

    q = critic_forward(state, action, params)
    jax.block_until_ready(q)

    # Pure-JAX reference with the same bf16 weight/activation quantization the
    # kernel applies (so it is numerically comparable) but no padding / splitting.
    w1, b1, w2, b2, w3, b3 = params
    x = jnp.concatenate([state, action], axis=1)
    h1 = jnp.maximum(
        jnp.dot(x.astype(jnp.bfloat16), w1.astype(jnp.bfloat16),
                preferred_element_type=jnp.float32) + b1, 0.0)
    h2 = jnp.maximum(
        jnp.dot(h1.astype(jnp.bfloat16), w2.astype(jnp.bfloat16),
                preferred_element_type=jnp.float32) + b2, 0.0)
    q_ref = jnp.sum(h2 * w3.T, axis=-1, keepdims=True) + b3

    assert q.shape == (B, 1)
    assert jnp.allclose(q, q_ref, atol=1e-2, rtol=1e-2), (q, q_ref)

    print("KERNEL_OK")
</pallas_src>

<mosaic_0001>
module attributes {stable_mosaic.version = 11 : i64} {
  func.func @critic_kernel(%arg0: i32, %arg1: memref<8x8xf32, #tpu.memory_space<vmem>>, %arg2: memref<8x2xf32, #tpu.memory_space<vmem>>, %arg3: memref<8x512xbf16, #tpu.memory_space<vmem>>, %arg4: memref<2x512xbf16, #tpu.memory_space<vmem>>, %arg5: memref<1x512xf32, #tpu.memory_space<vmem>>, %arg6: memref<512x384xbf16, #tpu.memory_space<vmem>>, %arg7: memref<1x384xf32, #tpu.memory_space<vmem>>, %arg8: memref<1x384xf32, #tpu.memory_space<vmem>>, %arg9: memref<1x1xf32, #tpu.memory_space<vmem>>, %arg10: memref<8x128xf32, #tpu.memory_space<vmem>>) attributes {dimension_semantics = [#tpu.dimension_semantics<parallel>], iteration_bounds = array<i64: 1>, scalar_prefetch = 0 : i64, scratch_operands = 0 : i64, tpu.core_type = #tpu.core_type<tc>, window_params = [{transform_indices = @transform_0, window_bounds = array<i64: 8, 8>}, {transform_indices = @transform_1, window_bounds = array<i64: 8, 2>}, {pipeline_mode = #tpu.pipeline_mode<synchronous>, transform_indices = @transform_2, window_bounds = array<i64: 8, 512>}, {pipeline_mode = #tpu.pipeline_mode<synchronous>, transform_indices = @transform_3, window_bounds = array<i64: 2, 512>}, {pipeline_mode = #tpu.pipeline_mode<synchronous>, transform_indices = @transform_4, window_bounds = array<i64: 1, 512>}, {pipeline_mode = #tpu.pipeline_mode<synchronous>, transform_indices = @transform_5, window_bounds = array<i64: 512, 384>}, {pipeline_mode = #tpu.pipeline_mode<synchronous>, transform_indices = @transform_6, window_bounds = array<i64: 1, 384>}, {pipeline_mode = #tpu.pipeline_mode<synchronous>, transform_indices = @transform_7, window_bounds = array<i64: 1, 384>}, {pipeline_mode = #tpu.pipeline_mode<synchronous>, transform_indices = @transform_8, window_bounds = array<i64: 1, 1>}, {transform_indices = @transform_9, window_bounds = array<i64: 8, 128>}]} {
    %c0 = arith.constant 0 : index
    %c0_0 = arith.constant 0 : index
    %0 = vector.load %arg1[%c0, %c0_0] : memref<8x8xf32, #tpu.memory_space<vmem>>, vector<8x8xf32>
    %1 = arith.truncf %0 : vector<8x8xf32> to vector<8x8xbf16>
    %c0_1 = arith.constant 0 : index
    %c0_2 = arith.constant 0 : index
    %2 = vector.load %arg2[%c0_1, %c0_2] : memref<8x2xf32, #tpu.memory_space<vmem>>, vector<8x2xf32>
    %3 = arith.truncf %2 : vector<8x2xf32> to vector<8x2xbf16>
    %c0_3 = arith.constant 0 : index
    %c0_4 = arith.constant 0 : index
    %4 = vector.load %arg3[%c0_3, %c0_4] : memref<8x512xbf16, #tpu.memory_space<vmem>>, vector<8x512xbf16>
    %cst = arith.constant dense<0.000000e+00> : vector<8x512xf32>
    %5 = tpu.matmul %1, %4, %cst {dimension_numbers = #tpu.dot_dimension_numbers<[1], [0], [0], [1], [0, 0, 1, 1], [], []>} : vector<8x8xbf16>, vector<8x512xbf16>, vector<8x512xf32> -> vector<8x512xf32>
    %c0_5 = arith.constant 0 : index
    %c0_6 = arith.constant 0 : index
    %6 = vector.load %arg4[%c0_5, %c0_6] : memref<2x512xbf16, #tpu.memory_space<vmem>>, vector<2x512xbf16>
    %cst_7 = arith.constant dense<0.000000e+00> : vector<8x512xf32>
    %7 = tpu.matmul %3, %6, %cst_7 {dimension_numbers = #tpu.dot_dimension_numbers<[1], [0], [0], [1], [0, 0, 1, 1], [], []>} : vector<8x2xbf16>, vector<2x512xbf16>, vector<8x512xf32> -> vector<8x512xf32>
    %8 = arith.addf %5, %7 : vector<8x512xf32>
    %c0_8 = arith.constant 0 : index
    %c0_9 = arith.constant 0 : index
    %9 = vector.load %arg5[%c0_8, %c0_9] : memref<1x512xf32, #tpu.memory_space<vmem>>, vector<1x512xf32>
    %10 = vector.broadcast %9 : vector<1x512xf32> to vector<8x512xf32>
    %11 = arith.addf %8, %10 : vector<8x512xf32>
    %cst_10 = arith.constant 0.000000e+00 : f32
    %12 = vector.broadcast %cst_10 : f32 to vector<8x512xf32>
    %13 = arith.maximumf %11, %12 : vector<8x512xf32>
    %14 = arith.truncf %13 : vector<8x512xf32> to vector<8x512xbf16>
    %c0_11 = arith.constant 0 : index
    %c0_12 = arith.constant 0 : index
    %15 = vector.load %arg6[%c0_11, %c0_12] : memref<512x384xbf16, #tpu.memory_space<vmem>>, vector<512x384xbf16>
    %cst_13 = arith.constant dense<0.000000e+00> : vector<8x384xf32>
    %16 = tpu.matmul %14, %15, %cst_13 {dimension_numbers = #tpu.dot_dimension_numbers<[1], [0], [0], [1], [0, 0, 1, 1], [], []>} : vector<8x512xbf16>, vector<512x384xbf16>, vector<8x384xf32> -> vector<8x384xf32>
    %c0_14 = arith.constant 0 : index
    %c0_15 = arith.constant 0 : index
    %17 = vector.load %arg7[%c0_14, %c0_15] : memref<1x384xf32, #tpu.memory_space<vmem>>, vector<1x384xf32>
    %18 = vector.broadcast %17 : vector<1x384xf32> to vector<8x384xf32>
    %19 = arith.addf %16, %18 : vector<8x384xf32>
    %cst_16 = arith.constant 0.000000e+00 : f32
    %20 = vector.broadcast %cst_16 : f32 to vector<8x384xf32>
    %21 = arith.maximumf %19, %20 : vector<8x384xf32>
    %c0_17 = arith.constant 0 : index
    %c0_18 = arith.constant 0 : index
    %22 = vector.load %arg8[%c0_17, %c0_18] : memref<1x384xf32, #tpu.memory_space<vmem>>, vector<1x384xf32>
    %23 = vector.broadcast %22 : vector<1x384xf32> to vector<8x384xf32>
    %24 = arith.mulf %21, %23 : vector<8x384xf32>
    %cst_19 = arith.constant dense<0.000000e+00> : vector<8xf32>
    %25 = vector.multi_reduction <add>, %24, %cst_19 [1] : vector<8x384xf32> to vector<8xf32>
    %26 = vector.shape_cast %25 : vector<8xf32> to vector<8x1xf32>
    %c0_20 = arith.constant 0 : index
    %c0_21 = arith.constant 0 : index
    %27 = vector.load %arg9[%c0_20, %c0_21] : memref<1x1xf32, #tpu.memory_space<vmem>>, vector<1x1xf32>
    %28 = vector.broadcast %27 : vector<1x1xf32> to vector<8x1xf32>
    %29 = arith.addf %26, %28 : vector<8x1xf32>
    %30 = vector.shape_cast %29 : vector<8x1xf32> to vector<8x1xf32>
    %31 = vector.broadcast %30 : vector<8x1xf32> to vector<8x128xf32>
    %c0_22 = arith.constant 0 : index
    %c0_23 = arith.constant 0 : index
    %32 = vector.load %arg10[%c0_22, %c0_23] : memref<8x128xf32, #tpu.memory_space<vmem>>, vector<8x128xf32>
    tpu.vector_store %arg10[%c0_22, %c0_23], %31 {strides = array<i32>} : memref<8x128xf32, #tpu.memory_space<vmem>>, vector<8x128xf32>,
    return
  }
  func.func @transform_0(%arg0: i32) -> (i32, i32) {
    %c0_i32 = arith.constant 0 : i32
    %c0_i32_0 = arith.constant 0 : i32
    return %arg0, %c0_i32 : i32, i32
  }
  func.func @transform_1(%arg0: i32) -> (i32, i32) {
    %c0_i32 = arith.constant 0 : i32
    %c0_i32_0 = arith.constant 0 : i32
    return %arg0, %c0_i32 : i32, i32
  }
  func.func @transform_2(%arg0: i32) -> (i32, i32) {
    %c0_i32 = arith.constant 0 : i32
    %c0_i32_0 = arith.constant 0 : i32
    %c0_i32_1 = arith.constant 0 : i32
    return %c0_i32, %c0_i32_0 : i32, i32
  }
  func.func @transform_3(%arg0: i32) -> (i32, i32) {
    %c0_i32 = arith.constant 0 : i32
    %c0_i32_0 = arith.constant 0 : i32
    %c0_i32_1 = arith.constant 0 : i32
    return %c0_i32, %c0_i32_0 : i32, i32
  }
  func.func @transform_4(%arg0: i32) -> (i32, i32) {
    %c0_i32 = arith.constant 0 : i32
    %c0_i32_0 = arith.constant 0 : i32
    %c0_i32_1 = arith.constant 0 : i32
    return %c0_i32, %c0_i32_0 : i32, i32
  }
  func.func @transform_5(%arg0: i32) -> (i32, i32) {
    %c0_i32 = arith.constant 0 : i32
    %c0_i32_0 = arith.constant 0 : i32
    %c0_i32_1 = arith.constant 0 : i32
    return %c0_i32, %c0_i32_0 : i32, i32
  }
  func.func @transform_6(%arg0: i32) -> (i32, i32) {
    %c0_i32 = arith.constant 0 : i32
    %c0_i32_0 = arith.constant 0 : i32
    %c0_i32_1 = arith.constant 0 : i32
    return %c0_i32, %c0_i32_0 : i32, i32
  }
  func.func @transform_7(%arg0: i32) -> (i32, i32) {
    %c0_i32 = arith.constant 0 : i32
    %c0_i32_0 = arith.constant 0 : i32
    %c0_i32_1 = arith.constant 0 : i32
    return %c0_i32, %c0_i32_0 : i32, i32
  }
  func.func @transform_8(%arg0: i32) -> (i32, i32) {
    %c0_i32 = arith.constant 0 : i32
    %c0_i32_0 = arith.constant 0 : i32
    %c0_i32_1 = arith.constant 0 : i32
    return %c0_i32, %c0_i32_0 : i32, i32
  }
  func.func @transform_9(%arg0: i32) -> (i32, i32) {
    %c0_i32 = arith.constant 0 : i32
    %c0_i32_0 = arith.constant 0 : i32
    return %arg0, %c0_i32 : i32, i32
  }
}

</mosaic_0001>

<bundles_post_ra>
// kernel: tpu_custom_call.1
= control target key start
LH: loop header
LB: loop body
LE: loop exit
PB: predicated region body
PF: predicated region fallthrough
CT: control target
= control target key end

     0   :  { %s1753_s0 = inlined_call_operand.hbm [shape: f32[8,8], index: 0, kind: input, shape index: {}]   ;;  %s1754_s1 = inlined_call_operand.vmem [shape: f32[8,2], index: 1, kind: input, shape index: {}]   ;;  %s1755_s2 = inlined_call_operand.vmem [shape: bf16[8,512], index: 2, kind: input, shape index: {}]   ;;  %s1756_s3 = inlined_call_operand.vmem [shape: bf16[2,512], index: 3, kind: input, shape index: {}]   ;;  %s1757_s4 = inlined_call_operand.vmem [shape: f32[1,512], index: 4, kind: input, shape index: {}]   ;;  %s1758_s5 = inlined_call_operand.hbm [shape: bf16[512,384], index: 5, kind: input, shape index: {}]   ;;  %s1759_s6 = inlined_call_operand.vmem [shape: f32[1,384], index: 6, kind: input, shape index: {}]   ;;  %s1760_s7 = inlined_call_operand.vmem [shape: f32[1,384], index: 7, kind: input, shape index: {}]   ;;  %s1761_s8 = inlined_call_operand.<no memory space> [shape: f32[1,1], index: 8, kind: input, shape index: {}]   ;;  %s1762_s9 = inlined_call_operand.hbm [shape: f32[8,128], index: 9, kind: output, shape index: {}]  }
   0x1   :  { %v14_v0 = vstv %s1761_s8 }
   0x2   :  { %15 = vst [vmem:[#allocation2] sm:$0x1] %v14_v0 }
   0x3   :  { %16 = vsyncpa [#allocation4], 0 }
   0x4   :  { %17 = vsyncpa [#allocation7], 0 }
   0x5   :  { %18 = vsyncpa [#allocation5], 0  ;;  %s1584_s11 = smov [#allocation3]   ;;  %s1585_s13 = smov [#allocation6]  }
   0x6   :  { %s25_s12 = sshll.u32 %s1584_s11, 4  ;;  %s42_s14 = sshll.u32 %s1585_s13, 4  ;;  %s26_s12 = int_to_ptr.vmem [resolvable:$true] %s25_s12  ;;  %s1644_s14 = int_to_ptr.vmem [resolvable:$true] %s42_s14 }
   0x7   :  { %s1512_s17 = scalar_lea.hbm %s1753_s0, 128 }
   0x8   :  { %p1513_p0 = scmp.ne.s32.totalorder %s1753_s0, %s1512_s17  ;;  %p1516_p1 = scmp.lt.u32.totalorder %s1512_s17, %s1753_s0 }
   0xa   :  { %p1518_p2 = pnand %p1516_p1, %p1513_p0 }
   0xc   :  { %1521 = shalt.err (!%p1518_p2)
}
   0xd   :  { %s1522_s21 = scalar_lea.vmem %s26_s12, 128  ;;  %p1527_p4 = scmp.lt.s32.totalorder %s26_s12, %s26_s12 }
   0xe   :  { %p1523_p3 = scmp.ne.s32.totalorder %s26_s12, %s1522_s21  ;;  %p1528_p5 = scmp.lt.s32.totalorder %s1522_s21, %s1522_s21 }
  0x10   :  { %p1529_p6 = por %p1528_p5, %p1527_p4 }
  0x12   :  { %p1530_p7 = pnand %p1529_p6, %p1523_p3 }
  0x14   :  { %1533 = shalt.err (!%p1530_p7)
}
  0x15   :  { %28 = dma.hbm_to_vmem [thread:$0]  %s1753_s0, 128, %s26_s12, [#allocation4]  }
  0x16   :  { %s1534_s26 = scalar_lea.hbm %s1758_s5, 12288 }
  0x17   :  { %p1535_p8 = scmp.ne.s32.totalorder %s1758_s5, %s1534_s26  ;;  %p1538_p9 = scmp.lt.u32.totalorder %s1534_s26, %s1758_s5 }
  0x19   :  { %p1540_p10 = pnand %p1538_p9, %p1535_p8 }
  0x1b   :  { %1543 = shalt.err (!%p1540_p10)
}
  0x1c   :  { %s1544_s10 = scalar_lea.vmem %s1644_s14, 12288  ;;  %p1549_p12 = scmp.lt.s32.totalorder %s1644_s14, %s1644_s14 }
  0x1d   :  { %p1545_p11 = scmp.ne.s32.totalorder %s1644_s14, %s1544_s10  ;;  %p1550_p13 = scmp.lt.s32.totalorder %s1544_s10, %s1544_s10 }
  0x1f   :  { %p1551_p0 = por %p1550_p13, %p1549_p12 }
  0x21   :  { %p1552_p1 = pnand %p1551_p0, %p1545_p11 }
  0x23   :  { %1555 = shalt.err (!%p1552_p1)
}
  0x24   :  { %s1586_s0 = smov 192   ;;  %s1587_s11 = smov 12  }
  0x25   :  { %48 = dma.hbm_to_vmem [thread:$0]  %s1758_s5, 12288, %s1644_s14, [#allocation7], %s1586_s0, %s1586_s0, %s1587_s11  }
  0x26   :  { %1578 = dma.done.wait [#allocation4], 128  }
  0x27   :  { %1579 = vsyncadd [#allocation4], 4294967168 }
  0x28   :  { %1580 = dma.done.wait [#allocation7], 12288  }
  0x29   :  { %1581 = vsyncadd [#allocation7], 4294955008  ;;  %v81_v1 = vlaneseq  ;;  %v1588_v2 = vmov 1966171168   ;;  %v1589_v4 = vmov 0   ;;  %vm98_vm0 = vcmask 1040384  }
  0x2a   :  { %v79_v3 = vunpack.c.l.s4 %v1588_v2  ;;  %143 = vmatprep.mubr.bf16.mxu1 %v1589_v4  ;;  %1379 = vset.pattern.permute.xlu0 %v1589_v4  ;;  %v1212_v8 = vld.sshfl [vmem:[%s1756_s3] sm:$0x33 pattern:$0x75316420]  ;;  %v1384_v12 = vld [vmem:[#allocation6 + $0x4] ss:$12 sps:$4 sm:$0xff]  }
  0x2b   :  { %v1677_v5 = vshrl.u32 %v81_v1, 7  ;;  %v77_v9 = vcombine.high %v1212_v8, %v1212_v8  ;;  %v64_v11 = vld [vmem:[%s1754_s1] sm:$0xff]  ;;  %v1386_v13 = vld [vmem:[#allocation6] ss:$12 sps:$4 sm:$0xff]   ;;  %993 = vmatprep.subr.bf16.mxu0 %v1384_v12  ;;  %vm94_vm1 = vcmask 15360   ;;  %vm207_vm2 = vcmask 1043456  }
  0x2c   :  { %v80_v6 = vunpack.c.0.s8 %v79_v3  ;;  %v1387_v17 = vld [vmem:[#allocation6 + $0x1c] ss:$12 sps:$4 sm:$0xff]   ;;  %v65_v20 = vpack.c.bf16 %v64_v11, %v64_v11  ;;  %994 = vmatpush1.bf16.msra.mxu0 %v1386_v13  ;;  %v1389_v21 = vld [vmem:[#allocation6 + $0x18] ss:$12 sps:$4 sm:$0xff]   ;;  %v1390_v24 = vld [vmem:[#allocation6 + $0x34] ss:$12 sps:$4 sm:$0xff]  }
  0x2d   :  { %v66_v18 = vld [vmem:[%s1755_s2] sm:$0xff]  ;;  %995 = vmatprep.subr.bf16.mxu0 %v1387_v17  ;;  %v67_v28 = vld [vmem:[%s1755_s2 + $0x8] sm:$0xff]  ;;  %vm203_vm3 = vcmask 64512  }
  0x2e   :  { %v83_v7 = vsub.s32 %v80_v6, %v1677_v5  ;;  %v1218_v23 = vcombine.high %v66_v18, %v66_v18  ;;  %v1392_v25 = vld [vmem:[#allocation6 + $0x30] ss:$12 sps:$4 sm:$0xff]   ;;  %v1393_v26 = vld [vmem:[#allocation6 + $0x4c] ss:$12 sps:$4 sm:$0xff]   ;;  %v1217_v27 = vcombine.low %v66_v18, %v66_v18  ;;  %v1395_v29 = vld [vmem:[#allocation6 + $0x48] ss:$12 sps:$4 sm:$0xff]   ;;  %v1220_v31 = vcombine.high %v67_v28, %v67_v28 }
  0x2f   :  { %v1396_v32 = vld [vmem:[#allocation6 + $0x64] ss:$12 sps:$4 sm:$0xff]   ;;  %v62_v33 = vld [vmem:[#allocation3] sm:$0xff]  ;;  %v1398_v34 = vld [vmem:[#allocation6 + $0x60] ss:$12 sps:$4 sm:$0xff]   ;;  %v1219_v36 = vcombine.low %v67_v28, %v67_v28 }
  0x30   :  { %v84_v10 = vrot.slane %v1212_v8, %v83_v7  ;;  %v91_v14 = vrot.slane %v77_v9, %v83_v7  ;;  %996 = vmatpush1.bf16.msra.mxu0 %v1389_v21  ;;  %v209_v30 = vsel %vm207_vm2, %v1217_v27, 0  ;;  %v1399_v35 = vld [vmem:[#allocation6 + $0x7c] ss:$12 sps:$4 sm:$0xff]   ;;  %v1401_v37 = vld [vmem:[#allocation6 + $0x78] ss:$12 sps:$4 sm:$0xff]   ;;  %v63_v38 = vpack.c.bf16 %v62_v33, %v62_v33 }
  0x31   :  { %997 = vmatprep.subr.bf16.mxu0 %v1390_v24  ;;  %v1402_v39 = vld [vmem:[#allocation6 + $0x94] ss:$12 sps:$4 sm:$0xff]   ;;  %v215_v41 = vsel %vm207_vm2, %v1219_v36, 0  ;;  %v1404_v42 = vld [vmem:[#allocation6 + $0x90] ss:$12 sps:$4 sm:$0xff]  }
  0x32   :  { %v92_v15 = vcombine.high %v84_v10, %v84_v10  ;;  %v100_v16 = vsel %vm98_vm0, %v84_v10, 0  ;;  %v93_v19 = vcombine.high %v91_v14, %v91_v14  ;;  %1213 = vmatprep.subr.msk.bf16.mxu1 %vm98_vm0, %v91_v14  ;;  %v1410_v40 = vld [vmem:[#allocation6 + $0xc8] ss:$12 sps:$4 sm:$0xff]   ;;  %v1405_v43 = vld [vmem:[#allocation6 + $0xac] ss:$12 sps:$4 sm:$0xff]  }
  0x33   :  { %112 = vmatpush1.bf16.msra.mxu1 %v100_v16  ;;  %v1407_v44 = vld [vmem:[#allocation6 + $0xa8] ss:$12 sps:$4 sm:$0xff]   ;;  %v1408_v45 = vld [vmem:[#allocation6 + $0xc4] ss:$12 sps:$4 sm:$0xff]   ;;  %v1415_v47 = vld [vmem:[#allocation6 + $0xe0] ss:$12 sps:$4 sm:$0xff]  }
  0x34   :  { %1215 = vmatprep.subr.msk.bf16.mxu1 %vm98_vm0, %v93_v19  ;;  %v106_v22 = vsel %vm98_vm0, %v92_v15, 0  ;;  %998 = vmatpush1.bf16.msra.mxu0 %v1392_v25  ;;  %v1412_v46 = vld [vmem:[#allocation6 + $0x8] ss:$12 sps:$4 sm:$0xff]   ;;  %v1411_v48 = vld [vmem:[#allocation6 + $0xc0] ss:$12 sps:$4 sm:$0xff]   ;;  %v1716_v25 = vsub.s32 1, %v1677_v5 }
  0x35   :  { %999 = vmatprep.subr.bf16.mxu0 %v1393_v26  ;;  %v1413_v49 = vld [vmem:[#allocation6 + $0xdc] ss:$12 sps:$4 sm:$0xff]   ;;  %v1417_v50 = vld [vmem:[#allocation6 + $0x20] ss:$12 sps:$4 sm:$0xff]   ;;  %v1416_v51 = vld [vmem:[#allocation6 + $0xd8] ss:$12 sps:$4 sm:$0xff]  }
  0x36   :  { %1214 = vmatmul.mubr.msk.bf16.vlgmr.msra.gmra.mrb[0].mxu1 %vm94_vm1, %v65_v20  ;;  %v1418_v52 = vld [vmem:[#allocation6 + $0xf4] ss:$12 sps:$4 sm:$0xff]   ;;  %v1420_v53 = vld [vmem:[#allocation6 + $0xf8] ss:$12 sps:$4 sm:$0xff]   ;;  %v1421_v54 = vld [vmem:[#allocation6 + $0xf0] ss:$12 sps:$4 sm:$0xff]  }
  0x37   :  { %153 = vmatpush1.bf16.msra.mxu1 %v106_v22  ;;  %184 = vmatprep.mubr.bf16.mxu1 %v1589_v4  ;;  %v1422_v55 = vld [vmem:[#allocation6 + $0x38] ss:$12 sps:$4 sm:$0xff]   ;;  %v1425_v57 = vld [vmem:[#allocation6 + $0x110] ss:$12 sps:$4 sm:$0xff]   ;;  %v1426_v58 = vld [vmem:[#allocation6 + $0x108] ss:$12 sps:$4 sm:$0xff]  }
  0x38   :  { %1221 = vmatprep.subr.msk.bf16.mxu1 %vm207_vm2, %v1218_v23  ;;  %1000 = vmatpush1.bf16.msra.mxu0 %v1395_v29  ;;  %v1423_v56 = vld [vmem:[#allocation6 + $0x10c] ss:$12 sps:$4 sm:$0xff]   ;;  %v1427_v59 = vld [vmem:[#allocation6 + $0x50] ss:$12 sps:$4 sm:$0xff]   ;;  %v1430_v61 = vld [vmem:[#allocation6 + $0x128] ss:$12 sps:$4 sm:$0xff]  }
  0x39   :  { %1001 = vmatprep.subr.bf16.mxu0 %v1396_v32  ;;  %v1428_v60 = vld [vmem:[#allocation6 + $0x124] ss:$12 sps:$4 sm:$0xff]   ;;  %v1431_v62 = vld [vmem:[#allocation6 + $0x120] ss:$12 sps:$4 sm:$0xff]   ;;  %v1432_v63 = vld [vmem:[#allocation6 + $0x68] ss:$12 sps:$4 sm:$0xff]  }
  0x3a   :  { %v1433_v0 = vld [vmem:[#allocation6 + $0x13c] ss:$12 sps:$4 sm:$0xff]   ;;  %v1435_v1 = vld [vmem:[#allocation6 + $0x140] ss:$12 sps:$4 sm:$0xff]   ;;  %v1436_v2 = vld [vmem:[#allocation6 + $0x138] ss:$12 sps:$4 sm:$0xff]  }
  0x3b   :  { %v1437_v3 = vld [vmem:[#allocation6 + $0x80] ss:$12 sps:$4 sm:$0xff]   ;;  %v1440_v6 = vld [vmem:[#allocation6 + $0x158] ss:$12 sps:$4 sm:$0xff]   ;;  %v1441_v7 = vld [vmem:[#allocation6 + $0x150] ss:$12 sps:$4 sm:$0xff]  }
  0x3c   :  { %1002 = vmatpush1.bf16.msra.mxu0 %v1398_v34  ;;  %v1442_v8 = vld [vmem:[#allocation6 + $0x98] ss:$12 sps:$4 sm:$0xff]   ;;  %v1445_v10 = vld [vmem:[#allocation6 + $0x170] ss:$12 sps:$4 sm:$0xff]   ;;  %v1446_v11 = vld [vmem:[#allocation6 + $0x168] ss:$12 sps:$4 sm:$0xff]  }
  0x3d   :  { %1003 = vmatprep.subr.bf16.mxu0 %v1399_v35  ;;  %v1443_v9 = vld [vmem:[#allocation6 + $0x16c] ss:$12 sps:$4 sm:$0xff]   ;;  %v1447_v12 = vld [vmem:[#allocation6 + $0xb0] ss:$12 sps:$4 sm:$0xff]   ;;  %v1451_v14 = vld [vmem:[#allocation6 + $0x248] ss:$12 sps:$4 sm:$0xff]  }
  0x3e   :  { %1216 = vmatmul.mubr.msk.bf16.vlgmr.msra.gmra.mrb[4].mxu1 %vm94_vm1, %v65_v20  ;;  %v1450_v13 = vld [vmem:[#allocation6 + $0x184] ss:$12 sps:$4 sm:$0xff]   ;;  %v1708_v23 = vsub.s32 0, %v1677_v5  ;;  %v1713_v24 = vld [vmem:[%s1757_s4] sm:$0xf]  ;;  %v318_v35 = vsub.s32 3, %v1677_v5 }
  0x3f   :  { %221 = vmatpush1.bf16.msra.mxu1 %v209_v30  ;;  %252 = vmatprep.mubr.bf16.mxu1 %v1589_v4  ;;  %v311_v28 = vrot.slane %v1713_v24, %v1716_v25 }
  0x40   :  { %1223 = vmatprep.subr.msk.bf16.mxu1 %vm207_vm2, %v1220_v31  ;;  %1004 = vmatpush1.bf16.msra.mxu0 %v1401_v37  ;;  %v307_v26 = vrot.slane %v1713_v24, %v1708_v23 }
  0x41   :  { %1005 = vmatprep.subr.bf16.mxu0 %v1402_v39 }
  0x44   :  { %1006 = vmatpush1.bf16.msra.mxu0 %v1404_v42  ;;  %v1448_v42 = vld [vmem:[#allocation6 + $0x180] ss:$12 sps:$4 sm:$0xff]  }
  0x45   :  { %1007 = vmatprep.subr.bf16.mxu0 %v1405_v43  ;;  %v1452_v43 = vld [vmem:[#allocation6 + $0x188] ss:$12 sps:$4 sm:$0xff]  }
  0x46   :  { %1222 = vmatmul.mubr.msk.bf16.vlgmr.msra.gmra.mrb[8].mxu1 %vm203_vm3, %v63_v38 }
  0x47   :  { %262 = vmatpush1.bf16.msra.mxu1 %v215_v41  ;;  %293 = vmatprep.mubr.bf16.mxu1 %v1589_v4  ;;  %v1438_v4 = vld [vmem:[#allocation6 + $0x154] ss:$12 sps:$4 sm:$0xff]  }
  0x48   :  { %1322 = vmatprep.subr.bf16.mxu1 %v1410_v40  ;;  %1008 = vmatpush1.bf16.msra.mxu0 %v1407_v44  ;;  %v319_v40 = vrot.slane %v1713_v24, %v318_v35  ;;  %v1503_v35 = vld [vmem:[#allocation6 + $0x2b8] ss:$12 sps:$4 sm:$0xff]  }
  0x49   :  { %1009 = vmatprep.subr.bf16.mxu0 %v1408_v45 }
  0x4c   :  { %1010 = vmatpush1.bf16.msra.mxu0 %v1411_v48  ;;  %v1456_v48 = vld [vmem:[#allocation6 + $0x260] ss:$12 sps:$4 sm:$0xff]  }
  0x4d   :  { %1011 = vmatprep.subr.bf16.mxu0 %v1413_v49 }
  0x4e   :  { %1224 = vmatmul.mubr.msk.bf16.vlgmr.msra.gmra.mrb[12].mxu1 %vm203_vm3, %v63_v38 }
  0x4f   :  { %1323 = vmatpush3.bf16.msra.mxu1 %v1412_v46 }
  0x50   :  { %1324 = vmatprep.subr.bf16.mxu1 %v1415_v47  ;;  %1012 = vmatpush1.bf16.msra.mxu0 %v1416_v51  ;;  %v1455_v47 = vld [vmem:[#allocation6 + $0x19c] ss:$12 sps:$4 sm:$0xff]  }
  0x51   :  { %1013 = vmatprep.subr.bf16.mxu0 %v1418_v52 }
  0x53   :  { %1325 = vmatpush3.bf16.msra.mxu1 %v1417_v50 }
  0x54   :  { %1326 = vmatprep.subr.bf16.mxu1 %v1420_v53  ;;  %1014 = vmatpush1.bf16.msra.mxu0 %v1421_v54  ;;  %v1453_v53 = vld [vmem:[#allocation6 + $0x198] ss:$12 sps:$4 sm:$0xff]   ;;  %v1457_v54 = vld [vmem:[#allocation6 + $0x1a0] ss:$12 sps:$4 sm:$0xff]  }
  0x55   :  { %1015 = vmatprep.subr.bf16.mxu0 %v1423_v56  ;;  %v1461_v56 = vld [vmem:[#allocation6 + $0x278] ss:$12 sps:$4 sm:$0xff]  }
  0x57   :  { %1327 = vmatpush3.bf16.msra.mxu1 %v1422_v55  ;;  %v1460_v55 = vld [vmem:[#allocation6 + $0x1b4] ss:$12 sps:$4 sm:$0xff]  }
  0x58   :  { %1328 = vmatprep.subr.bf16.mxu1 %v1425_v57  ;;  %1016 = vmatpush1.bf16.msra.mxu0 %v1426_v58 }
  0x59   :  { %1017 = vmatprep.subr.bf16.mxu0 %v1428_v60  ;;  %v1462_v60 = vld [vmem:[#allocation6 + $0x1b8] ss:$12 sps:$4 sm:$0xff]  }
  0x5b   :  { %1329 = vmatpush3.bf16.msra.mxu1 %v1427_v59  ;;  %v1458_v59 = vld [vmem:[#allocation6 + $0x1b0] ss:$12 sps:$4 sm:$0xff]  }
  0x5c   :  { %1330 = vmatprep.subr.bf16.mxu1 %v1430_v61  ;;  %1018 = vmatpush1.bf16.msra.mxu0 %v1431_v62  ;;  %v1465_v61 = vld [vmem:[#allocation6 + $0x1cc] ss:$12 sps:$4 sm:$0xff]   ;;  %v1466_v62 = vld [vmem:[#allocation6 + $0x290] ss:$12 sps:$4 sm:$0xff]  }
  0x5d   :  { %1019 = vmatprep.subr.bf16.mxu0 %v1433_v0  ;;  %v1467_v0 = vld [vmem:[#allocation6 + $0x1d0] ss:$12 sps:$4 sm:$0xff]  }
  0x5f   :  { %1331 = vmatpush3.bf16.msra.mxu1 %v1432_v63  ;;  %v1463_v63 = vld [vmem:[#allocation6 + $0x1c8] ss:$12 sps:$4 sm:$0xff]  }
  0x60   :  { %1332 = vmatprep.subr.bf16.mxu1 %v1435_v1  ;;  %1020 = vmatpush1.bf16.msra.mxu0 %v1436_v2  ;;  %v1470_v1 = vld [vmem:[#allocation6 + $0x1e4] ss:$12 sps:$4 sm:$0xff]   ;;  %v1471_v2 = vld [vmem:[#allocation6 + $0x2a8] ss:$12 sps:$4 sm:$0xff]  }
  0x61   :  { %1021 = vmatprep.subr.bf16.mxu0 %v1438_v4  ;;  %v1472_v4 = vld [vmem:[#allocation6 + $0x1e8] ss:$12 sps:$4 sm:$0xff]  }
  0x63   :  { %1333 = vmatpush3.bf16.msra.mxu1 %v1437_v3  ;;  %v1468_v3 = vld [vmem:[#allocation6 + $0x1e0] ss:$12 sps:$4 sm:$0xff]  }
  0x64   :  { %1334 = vmatprep.subr.bf16.mxu1 %v1440_v6  ;;  %1022 = vmatpush1.bf16.msra.mxu0 %v1441_v7  ;;  %v1725_v6 = vsub.s32 2, %v1677_v5  ;;  %v1475_v7 = vld [vmem:[#allocation6 + $0x1fc] ss:$12 sps:$4 sm:$0xff]   ;;  %v1482_v5 = vld [vmem:[#allocation6 + $0x218] ss:$12 sps:$4 sm:$0xff]  }
  0x65   :  { %1023 = vmatprep.subr.bf16.mxu0 %v1443_v9  ;;  %v1473_v9 = vld [vmem:[#allocation6 + $0x1f8] ss:$12 sps:$4 sm:$0xff]  }
  0x67   :  { %1335 = vmatpush3.bf16.msra.mxu1 %v1442_v8  ;;  %v1476_v8 = vld [vmem:[#allocation6 + $0x2c0] ss:$12 sps:$4 sm:$0xff]  }
  0x68   :  { %1336 = vmatprep.subr.bf16.mxu1 %v1445_v10  ;;  %1024 = vmatpush1.bf16.msra.mxu0 %v1446_v11  ;;  %v1477_v10 = vld [vmem:[#allocation6 + $0x200] ss:$12 sps:$4 sm:$0xff]   ;;  %v315_v11 = vrot.slane %v1713_v24, %v1725_v6 }
  0x69   :  { %1034 = vmatprep.subr.bf16.mxu0 %v1450_v13  ;;  %v1481_v13 = vld [vmem:[#allocation6 + $0x2d8] ss:$12 sps:$4 sm:$0xff]  }
  0x6b   :  { %1337 = vmatpush3.bf16.msra.mxu1 %v1447_v12  ;;  %v1480_v12 = vld [vmem:[#allocation6 + $0x214] ss:$12 sps:$4 sm:$0xff]  }
  0x6c   :  { %1344 = vmatprep.subr.bf16.mxu1 %v1451_v14  ;;  %v1478_v14 = vld [vmem:[#allocation6 + $0x210] ss:$12 sps:$4 sm:$0xff]  }
 0x109   :  { %v145_v15 = vpop.f32.mrb[0].mxu1 }
 0x10a   :  { %v147_v16 = vpop.f32.mrb[1].mxu1 }
 0x10b   :  { %v149_v17 = vpop.f32.mrb[2].mxu1 }
 0x10c   :  { %v150_v18 = vpop.f32.mrb[3].mxu1  ;;  %v1486_v17 = vld [vmem:[#allocation6 + $0x2f0] ss:$12 sps:$4 sm:$0xff]  }
 0x10d   :  { %v1483_v18 = vld [vmem:[#allocation6 + $0x228] ss:$12 sps:$4 sm:$0xff]  }
 0x111   :  { %v186_v19 = vpop.f32.mrb[4].mxu1 }
 0x112   :  { %v188_v20 = vpop.f32.mrb[5].mxu1 }
 0x113   :  { %v190_v21 = vpop.f32.mrb[6].mxu1 }
 0x114   :  { %v191_v22 = vpop.f32.mrb[7].mxu1  ;;  %v1490_v21 = vld [vmem:[#allocation6 + $0x244] ss:$12 sps:$4 sm:$0xff]  }
 0x115   :  { %v1488_v22 = vld [vmem:[#allocation6 + $0x240] ss:$12 sps:$4 sm:$0xff]  }
 0x119   :  { %v254_v27 = vpop.f32.mrb[8].mxu1 }
 0x11a   :  { %v255_v29 = vadd.f32 %v254_v27, %v145_v15  ;;  %v256_v30 = vpop.f32.mrb[9].mxu1  ;;  %v1491_v27 = vld [vmem:[#allocation6 + $0x258] ss:$12 sps:$4 sm:$0xff]  }
 0x11b   :  { %v257_v31 = vadd.f32 %v256_v30, %v147_v16  ;;  %v258_v32 = vpop.f32.mrb[10].mxu1  ;;  %v1485_v16 = vld [vmem:[#allocation6 + $0x22c] ss:$12 sps:$4 sm:$0xff]  }
 0x11c   :  { %v324_v33 = vadd.f32 %v307_v26, %v255_v29  ;;  %v259_v34 = vpop.f32.mrb[11].mxu1  ;;  %v1493_v26 = vld [vmem:[#allocation6 + $0x25c] ss:$12 sps:$4 sm:$0xff]   ;;  %v1499_v30 = vld [vmem:[#allocation6 + $0x28c] ss:$12 sps:$4 sm:$0xff]  }
 0x11d   :  { %v325_v36 = vadd.f32 %v311_v28, %v257_v31  ;;  %v1496_v28 = vld [vmem:[#allocation6 + $0x274] ss:$12 sps:$4 sm:$0xff]   ;;  %v1494_v29 = vld [vmem:[#allocation6 + $0x270] ss:$12 sps:$4 sm:$0xff]  }
 0x11e   :  { %v328_v37 = vmax.f32 %v324_v33, 0.0  ;;  %v1497_v31 = vld [vmem:[#allocation6 + $0x288] ss:$12 sps:$4 sm:$0xff]   ;;  %v1502_v32 = vld [vmem:[#allocation6 + $0x2a4] ss:$12 sps:$4 sm:$0xff]  }
 0x11f   :  { %v329_v38 = vmax.f32 %v325_v36, 0.0  ;;  %v1500_v33 = vld [vmem:[#allocation6 + $0x2a0] ss:$12 sps:$4 sm:$0xff]   ;;  %v1505_v34 = vld [vmem:[#allocation6 + $0x2bc] ss:$12 sps:$4 sm:$0xff]  }
 0x120   :  { %v332_v44 = vpack.c.bf16 %v328_v37, %v328_v37  ;;  %v1508_v36 = vld [vmem:[#allocation6 + $0x2d4] ss:$12 sps:$4 sm:$0xff]   ;;  %v1506_v37 = vld [vmem:[#allocation6 + $0x2d0] ss:$12 sps:$4 sm:$0xff]  }
 0x121   :  { %v295_v39 = vpop.f32.mrb[12].mxu1  ;;  %v333_v41 = vpack.c.bf16 %v329_v38, %v329_v38  ;;  %v1511_v38 = vld [vmem:[#allocation6 + $0x2ec] ss:$12 sps:$4 sm:$0xff]  }
 0x122   :  { %v296_v45 = vadd.f32 %v295_v39, %v186_v19  ;;  %v297_v46 = vpop.f32.mrb[13].mxu1  ;;  %v1487_v19 = vld [vmem:[#allocation6 + $0x230] ss:$12 sps:$4 sm:$0xff]   ;;  %v1509_v39 = vld [vmem:[#allocation6 + $0x2e8] ss:$12 sps:$4 sm:$0xff]  }
 0x123   :  { %v298_v49 = vadd.f32 %v297_v46, %v188_v20  ;;  %1025 = vmatprep.mubr.bf16.mxu0 %v333_v41  ;;  %1107 = vmatprep.mubr.bf16.mxu1 %v333_v41  ;;  %v299_v50 = vpop.f32.mrb[14].mxu1 }
 0x124   :  { %1026 = vmatmul.mubr.bf16.vlgmr.msra.gmra.mrb[0].mxu0 %v332_v44  ;;  %1108 = vmatmul.mubr.bf16.vlgmr.msra.gmra.mrb[16].mxu1 %v332_v44  ;;  %v300_v51 = vpop.f32.mrb[15].mxu1  ;;  %v326_v15 = vadd.f32 %v315_v11, %v296_v45  ;;  %v464_v45 = vld [vmem:[%s1759_s6] sm:$0x7]  ;;  %s1590_s6 = smov [#allocation8]  }
 0x125   :  { %v327_v52 = vadd.f32 %v319_v40, %v298_v49  ;;  %1035 = vmatpush1.bf16.msra.mxu0 %v1448_v42  ;;  %1345 = vmatpush3.bf16.msra.mxu1 %v1452_v43  ;;  %v477_v46 = vrot.slane %v464_v45, %v1725_v6 }
 0x126   :  { %1036 = vmatprep.subr.bf16.mxu0 %v1455_v47  ;;  %1346 = vmatprep.subr.bf16.mxu1 %v1456_v48  ;;  %v330_v20 = vmax.f32 %v326_v15, 0.0 }
 0x127   :  { %v331_v57 = vmax.f32 %v327_v52, 0.0 }
 0x128   :  { %v334_v24 = vpack.c.bf16 %v330_v20, %v330_v20 }
 0x129   :  { %v335_v58 = vpack.c.bf16 %v331_v57, %v331_v57  ;;  %1037 = vmatpush1.bf16.msra.mxu0 %v1453_v53  ;;  %1347 = vmatpush3.bf16.msra.mxu1 %v1457_v54  ;;  %v469_v54 = vrot.slane %v464_v45, %v1708_v23  ;;  %v1158_v57 = vld [vmem:[%s1760_s7] sm:$0x7]  ;;  %s1202_s7 = sshll.u32 %s1590_s6, 4  ;;  %s1203_s7 = int_to_ptr.vmem [resolvable:$true] %s1202_s7 }
 0x12a   :  { %1038 = vmatprep.subr.bf16.mxu0 %v1460_v55  ;;  %1348 = vmatprep.subr.bf16.mxu1 %v1461_v56  ;;  %v473_v55 = vrot.slane %v464_v45, %v1716_v25  ;;  %s1556_s22 = scalar_lea.vmem %s1203_s7, 128  ;;  %p1561_p3 = scmp.lt.s32.totalorder %s1203_s7, %s1203_s7 }
 0x12b   :  { %1066 = vmatprep.mubr.bf16.mxu0 %v335_v58  ;;  %1147 = vmatprep.mubr.bf16.mxu1 %v335_v58  ;;  %p1557_p2 = scmp.ne.s32.totalorder %s1203_s7, %s1556_s22  ;;  %p1562_p4 = scmp.lt.s32.totalorder %s1556_s22, %s1556_s22 }
 0x12d   :  { %1039 = vmatpush1.bf16.msra.mxu0 %v1458_v59  ;;  %1349 = vmatpush3.bf16.msra.mxu1 %v1462_v60  ;;  %v1163_v59 = vrot.slane %v1158_v57, %v1708_v23  ;;  %p1563_p5 = por %p1562_p4, %p1561_p3 }
 0x12e   :  { %1040 = vmatprep.subr.bf16.mxu0 %v1465_v61  ;;  %1350 = vmatprep.subr.bf16.mxu1 %v1466_v62  ;;  %v1167_v62 = vrot.slane %v1158_v57, %v1716_v25 }
 0x12f   :  { %p1564_p6 = pnand %p1563_p5, %p1557_p2 }
 0x131   :  { %1041 = vmatpush1.bf16.msra.mxu0 %v1463_v63  ;;  %1351 = vmatpush3.bf16.msra.mxu1 %v1467_v0 }
 0x132   :  { %1042 = vmatprep.subr.bf16.mxu0 %v1470_v1  ;;  %1352 = vmatprep.subr.bf16.mxu1 %v1471_v2 }
 0x135   :  { %1043 = vmatpush1.bf16.msra.mxu0 %v1468_v3  ;;  %1353 = vmatpush3.bf16.msra.mxu1 %v1472_v4  ;;  %v1171_v4 = vrot.slane %v1158_v57, %v1725_v6 }
 0x136   :  { %1044 = vmatprep.subr.bf16.mxu0 %v1475_v7  ;;  %1354 = vmatprep.subr.bf16.mxu1 %v1476_v8 }
 0x139   :  { %1045 = vmatpush1.bf16.msra.mxu0 %v1473_v9  ;;  %1355 = vmatpush3.bf16.msra.mxu1 %v1477_v10 }
 0x13a   :  { %1046 = vmatprep.subr.bf16.mxu0 %v1480_v12  ;;  %1356 = vmatprep.subr.bf16.mxu1 %v1481_v13  ;;  %v1321_v12 = vld [vmem:[#allocation2] ss:$0 sm:$0xff] }
 0x13d   :  { %1047 = vmatpush1.bf16.msra.mxu0 %v1478_v14  ;;  %1357 = vmatpush3.bf16.msra.mxu1 %v1482_v5 }
 0x13e   :  { %1048 = vmatprep.subr.bf16.mxu0 %v1485_v16  ;;  %1358 = vmatprep.subr.bf16.mxu1 %v1486_v17 }
 0x141   :  { %1049 = vmatpush1.bf16.msra.mxu0 %v1483_v18  ;;  %1359 = vmatpush3.bf16.msra.mxu1 %v1487_v19 }
 0x142   :  { %1050 = vmatprep.subr.bf16.mxu0 %v1490_v21 }
 0x144   :  { %1148 = vmatmul.mubr.bf16.vlgmr.msra.gmra.mrb[20].mxu1 %v334_v24 }
 0x145   :  { %1051 = vmatpush1.bf16.msra.mxu0 %v1488_v22 }
 0x146   :  { %1052 = vmatprep.subr.bf16.mxu0 %v1493_v26 }
 0x149   :  { %1053 = vmatpush1.bf16.msra.mxu0 %v1491_v27 }
 0x14a   :  { %1054 = vmatprep.subr.bf16.mxu0 %v1496_v28 }
 0x14d   :  { %1055 = vmatpush1.bf16.msra.mxu0 %v1494_v29 }
 0x14e   :  { %1056 = vmatprep.subr.bf16.mxu0 %v1499_v30 }
 0x151   :  { %1057 = vmatpush1.bf16.msra.mxu0 %v1497_v31 }
 0x152   :  { %1058 = vmatprep.subr.bf16.mxu0 %v1502_v32 }
 0x155   :  { %1059 = vmatpush1.bf16.msra.mxu0 %v1500_v33 }
 0x156   :  { %1060 = vmatprep.subr.bf16.mxu0 %v1505_v34 }
 0x159   :  { %1061 = vmatpush1.bf16.msra.mxu0 %v1503_v35 }
 0x15a   :  { %1062 = vmatprep.subr.bf16.mxu0 %v1508_v36 }
 0x15d   :  { %1063 = vmatpush1.bf16.msra.mxu0 %v1506_v37 }
 0x15e   :  { %1064 = vmatprep.subr.bf16.mxu0 %v1511_v38 }
 0x161   :  { %1065 = vmatpush1.bf16.msra.mxu0 %v1509_v39 }
 0x164   :  { %1067 = vmatmul.mubr.bf16.vlgmr.msra.gmra.mrb[0].mxu0 %v334_v24 }
 0x1f7   :  { %v1338_v40 = vpop.f32.mrb[16].mxu1 }
 0x1f8   :  { %v1339_v41 = vpop.f32.mrb[17].mxu1 }
 0x1f9   :  { %v1340_v42 = vadd.f32 %v1339_v41, %v1338_v40  ;;  %v1341_v43 = vpop.f32.mrb[18].mxu1 }
 0x1fa   :  { %v1342_v44 = vpop.f32.mrb[19].mxu1 }
 0x1fb   :  { %v1110_v49 = vadd.f32 %v1340_v42, %v477_v46 }
 0x217   :  { %v1360_v47 = vpop.f32.mrb[20].mxu1 }
 0x218   :  { %v1361_v48 = vpop.f32.mrb[21].mxu1 }
 0x219   :  { %v1362_v50 = vadd.f32 %v1361_v48, %v1360_v47  ;;  %v1363_v51 = vpop.f32.mrb[22].mxu1 }
 0x21a   :  { %v1364_v52 = vpop.f32.mrb[23].mxu1 }
 0x21b   :  { %v1150_v53 = vadd.f32 %v1362_v50, %v1110_v49 }
 0x21d   :  { %v1157_v2 = vmax.f32 %v1150_v53, 0.0 }
 0x21f   :  { %v1177_v9 = vmul.f32 %v1171_v4, %v1157_v2 }
 0x237   :  { %v1068_v56 = vpop.f32.mrb[0].mxu0 }
 0x238   :  { %v1366_v58 = vadd.f32 %v1068_v56, %v469_v54  ;;  %v1070_v60 = vpop.f32.mrb[1].mxu0 }
 0x239   :  { %v1367_v61 = vadd.f32 %v1070_v60, %v473_v55  ;;  %v1072_v63 = vpop.f32.mrb[2].mxu0 }
 0x23a   :  { %v1155_v0 = vmax.f32 %v1366_v58, 0.0  ;;  %v1073_v1 = vpop.f32.mrb[3].mxu0 }
 0x23b   :  { %v1156_v3 = vmax.f32 %v1367_v61, 0.0 }
 0x23c   :  { %v1175_v7 = vmul.f32 %v1163_v59, %v1155_v0 }
 0x23d   :  { %v1176_v8 = vmul.f32 %v1167_v62, %v1156_v3 }
 0x23f   :  { %v1178_v10 = vadd.f32 %v1176_v8, %v1175_v7 }
 0x241   :  { %v1179_v11 = vadd.f32 %v1178_v10, %v1177_v9 }
 0x243   :  { %1180 = vadd.xlane.f32.xlu0 %v1179_v11 }
 0x2d0   :  { %v1181_v13 = vpop.xlane.xlu0 %1180 }
 0x2d1   :  { %v1189_v23 = vadd.f32 %v1321_v12, %v1181_v13 }
 0x2d3   :  { %1192 = vperm.xlu0 %1379, %v1189_v23  }
 0x352   :  { %v1193_v25 = vpop.permute.xlu0 %1192 }
 0x353   :  { %1195 = vst [vmem:[#allocation8] sm:$0xff] %v1193_v25 }
 0x354   :  { %1567 = shalt.err (!%p1564_p6)
}
 0x355   :  { %s1568_s25 = scalar_lea.hbm %s1762_s9, 128 }
 0x356   :  { %p1569_p7 = scmp.ne.s32.totalorder %s1762_s9, %s1568_s25  ;;  %p1572_p8 = scmp.lt.u32.totalorder %s1568_s25, %s1762_s9 }
 0x358   :  { %p1574_p9 = pnand %p1572_p8, %p1569_p7 }
 0x35a   :  { %1577 = shalt.err (!%p1574_p9)
}
 0x35b   :  { %1205 = dma.vmem_to_hbm [thread:$0]  %s1203_s7, 128, %s1762_s9, [#allocation5]  }
 0x35c   :  { %1582 = dma.done.wait [#allocation5], 128  }
 0x35d   :  { %1583 = vsyncadd [#allocation5], 4294967168 }
 0x35e   :  { %1209 = vsyncpa [#allocation4], 1 }
 0x35f   :  { %1210 = vsyncpa [#allocation7], 1 }
 0x360   :  { %1211 = vsyncpa [#allocation5], 1 }

</bundles_post_ra>
